<compile_context>
chip_gen: v5e
topology: v5e:2x2
jax: 0.10.0
libtpu: 0.0.40
codegen_flags: <defaults>
</compile_context>

<pallas_src>
import jax
import jax.numpy as jnp
from jax.experimental import pallas as pl
from jax.experimental.pallas import tpu as pltpu


def _round_up(x: int, m: int) -> int:
    return pl.cdiv(x, m) * m


def _largest_tile(dim_padded: int, base: int, cap: int) -> int:
    """Largest multiple of `base` that divides `dim_padded` and is <= cap."""
    cap = max(base, min(cap, dim_padded))
    best, t = base, base
    while t <= cap:
        if dim_padded % t == 0:
            best = t
        t += base
    return best


def _vmem_limit_bytes() -> int:
    """Per-generation scoped VMEM limit with headroom for Mosaic internals."""
    cap = 128 * 1024 * 1024
    try:
        info = pltpu.get_tpu_info()
        cap = int(getattr(info, "vmem_capacity_bytes", cap))
    except Exception:
        pass
    # v7x: 64 MiB physical -> 48 MiB; v5e/v6e: 128 MiB -> 112 MiB.
    return max(32 * 1024 * 1024, cap - 16 * 1024 * 1024)


def _maybe_pad2(a, rows: int, cols: int):
    if a.shape == (rows, cols):
        return a
    return jnp.pad(a, ((0, rows - a.shape[0]), (0, cols - a.shape[1])))


# ---------------------------------------------------------------------------
# Kernels
# ---------------------------------------------------------------------------
def _linear_kernel_multi_k(x_ref, w_ref, b_ref, o_ref, acc_ref):
    """Grid = (Mp//tm, Np//tn, Kp//tk); K is the (arbitrary) reduction axis."""
    k = pl.program_id(2)

    @pl.when(k == 0)
    def _():
        # Fold bias into the accumulator init (no epilogue add).
        acc_ref[...] = jnp.broadcast_to(
            b_ref[...].astype(jnp.float32), acc_ref.shape)

    acc_ref[...] += jnp.dot(
        x_ref[...], w_ref[...], preferred_element_type=jnp.float32)

    @pl.when(k == pl.num_programs(2) - 1)
    def _():
        o_ref[...] = acc_ref[...].astype(o_ref.dtype)


def _linear_kernel_single_k(x_ref, w_ref, b_ref, o_ref):
    """Grid = (Mp//tm, Np//tn); whole K in one tile -> no scratch accumulator."""
    acc = jnp.dot(x_ref[...], w_ref[...], preferred_element_type=jnp.float32)
    acc = acc + b_ref[...].astype(jnp.float32)
    o_ref[...] = acc.astype(o_ref.dtype)


# ---------------------------------------------------------------------------
# Wrapper
# ---------------------------------------------------------------------------
def my_linear(x, weight_t, bias=None, *, tm=None, tn=None, tk=None,
              compute_dtype=None, out_dtype=None):
    """y = x @ weight_t + bias via a Pallas TPU kernel.

    x:         (..., K)  (arbitrary leading dims, like nn.Linear)
    weight_t:  (K, N)    PyTorch weight transposed.  Pass it pre-cast to
                         `compute_dtype` to skip the per-call cast pass.
    bias:      (N,) or None
    compute_dtype: dtype fed to the MXU. Defaults to x.dtype (f32 parity with
                   the reference). bf16 is an explicit opt-in (f32 accumulation
                   is kept either way).
    out_dtype: output dtype (defaults to x.dtype).
    """
    orig_shape = x.shape
    K = orig_shape[-1]
    x2d = x.reshape(-1, K)
    M = x2d.shape[0]
    K2, N = weight_t.shape
    assert K == K2, (K, K2)

    compute_dtype = jnp.dtype(compute_dtype or x.dtype)
    out_dtype = jnp.dtype(out_dtype or x.dtype)

    if bias is None:
        bias = jnp.zeros((N,), dtype=jnp.float32)
    assert bias.shape == (N,)

    # --- Minimal-alignment padding, then divisor-aware tile selection -------
    # bf16 packs 16 rows per sublane pair; f32 needs 8.
    base_m = 16 if compute_dtype == jnp.bfloat16 else 8
    Mp = _round_up(M, base_m)
    Np = _round_up(N, 128)
    Kp = _round_up(K, 128)

    tm = tm or _largest_tile(Mp, base_m, 512)
    tn = tn or _largest_tile(Np, 128, 512)
    tk = tk or _largest_tile(Kp, 128, 1024)
    assert Mp % tm == 0 and Np % tn == 0 and Kp % tk == 0
    assert tm % base_m == 0 and tn % 128 == 0 and tk % 128 == 0

    # Megacore-aware GEMV shape: if the i axis has a single block, keep the
    # 'parallel' j axis split in >= 2 blocks so both TCs (v7x) get work.
    if Mp // tm == 1 and Np // tn == 1 and Np >= 256:
        tn = _largest_tile(Np, 128, Np // 2)

    # --- Pad / cast only when needed (no-op for pre-prepared operands) ------
    x_p = _maybe_pad2(x2d, Mp, Kp)
    if x_p.dtype != compute_dtype:
        x_p = x_p.astype(compute_dtype)
    w_p = _maybe_pad2(weight_t, Kp, Np)
    if w_p.dtype != compute_dtype:
        w_p = w_p.astype(compute_dtype)
    b_p = bias.astype(jnp.float32)
    if Np != N:
        b_p = jnp.pad(b_p, (0, Np - N))
    b_p = b_p.reshape(1, Np)

    n_k = Kp // tk
    grid_ij = (Mp // tm, Np // tn)

    cost = pl.CostEstimate(
        flops=2 * M * N * K,
        transcendentals=0,
        bytes_accessed=(x_p.size * x_p.dtype.itemsize
                        + w_p.size * w_p.dtype.itemsize
                        + Mp * Np * out_dtype.itemsize),
    )
    compiler_params = dict(vmem_limit_bytes=_vmem_limit_bytes())

    if n_k == 1:
        # Single reduction step: no scratch accumulator, no pl.when branches.
        y_p = pl.pallas_call(
            _linear_kernel_single_k,
            out_shape=jax.ShapeDtypeStruct((Mp, Np), out_dtype),
            grid_spec=pltpu.PrefetchScalarGridSpec(
                num_scalar_prefetch=0,
                grid=grid_ij,
                in_specs=[
                    pl.BlockSpec((tm, Kp), lambda i, j: (i, 0)),   # x tile
                    pl.BlockSpec((Kp, tn), lambda i, j: (0, j)),   # W tile
                    pl.BlockSpec((1, tn), lambda i, j: (0, j)),    # bias tile
                ],
                out_specs=pl.BlockSpec((tm, tn), lambda i, j: (i, j)),
            ),
            compiler_params=pltpu.CompilerParams(
                dimension_semantics=("parallel", "parallel"),
                **compiler_params),
            cost_estimate=cost,
        )(x_p, w_p, b_p)
    else:
        y_p = pl.pallas_call(
            _linear_kernel_multi_k,
            out_shape=jax.ShapeDtypeStruct((Mp, Np), out_dtype),
            grid_spec=pltpu.PrefetchScalarGridSpec(
                num_scalar_prefetch=0,
                grid=grid_ij + (n_k,),
                in_specs=[
                    pl.BlockSpec((tm, tk), lambda i, j, k: (i, k)),   # x tile
                    pl.BlockSpec((tk, tn), lambda i, j, k: (k, j)),   # W tile
                    pl.BlockSpec((1, tn), lambda i, j, k: (0, j)),    # bias tile
                ],
                out_specs=pl.BlockSpec((tm, tn), lambda i, j, k: (i, j)),
                scratch_shapes=[pltpu.VMEM((tm, tn), jnp.float32)],
            ),
            compiler_params=pltpu.CompilerParams(
                dimension_semantics=("parallel", "parallel", "arbitrary"),
                **compiler_params),
            cost_estimate=cost,
        )(x_p, w_p, b_p)

    y = y_p[:M, :N]
    return y.reshape(*orig_shape[:-1], N)


if __name__ == "__main__":
    key = jax.random.PRNGKey(0)
    kx, kw, kb, kx2 = jax.random.split(key, 4)

    # ---- Test 1: My_Linear-sized call (batch=8, in=32, out=64), f32 path ----
    M, K, N = 8, 32, 64
    x = jax.random.normal(kx, (M, K), dtype=jnp.float32)
    bound = 1.0 / (K ** 0.5)
    weight = jax.random.uniform(kw, (N, K), minval=-bound, maxval=bound,
                                dtype=jnp.float32)   # PyTorch layout (out, in)
    bias = jax.random.uniform(kb, (N,), minval=-bound, maxval=bound,
                              dtype=jnp.float32)
    weight_t = weight.T                               # (K, N)
    y_ref = x @ weight_t + bias

    y_f32 = jax.block_until_ready(my_linear(x, weight_t, bias))
    assert y_f32.shape == (M, N)
    assert jnp.allclose(y_f32, y_ref, atol=1e-5, rtol=1e-5)

    # bf16 MXU opt-in path (f32 accumulation), loose tolerance vs f32 reference.
    y_bf16 = jax.block_until_ready(
        my_linear(x, weight_t, bias, compute_dtype=jnp.bfloat16))
    assert y_bf16.shape == (M, N)
    assert jnp.allclose(y_bf16, y_ref, atol=5e-2, rtol=5e-2)

    # ---- Test 2: 3-D input + forced multi-K-step accumulation path ----------
    B, S, K2, N2 = 2, 8, 256, 128
    x3 = jax.random.normal(kx2, (B, S, K2), dtype=jnp.float32)
    w2 = jax.random.uniform(kw, (N2, K2), minval=-1e-1, maxval=1e-1,
                            dtype=jnp.float32)
    b2 = jax.random.uniform(kb, (N2,), minval=-1e-1, maxval=1e-1,
                            dtype=jnp.float32)
    y3_ref = x3 @ w2.T + b2
    y3 = jax.block_until_ready(my_linear(x3, w2.T, b2, tk=128))  # Kp//tk == 2
    assert y3.shape == (B, S, N2)
    assert jnp.allclose(y3, y3_ref, atol=1e-5, rtol=1e-5)

    print("KERNEL_OK")
</pallas_src>

<mosaic_0001>
module attributes {stable_mosaic.version = 11 : i64} {
  func.func @_linear_kernel_single_k(%arg0: i32, %arg1: i32, %arg2: memref<8x128xf32, #tpu.memory_space<vmem>>, %arg3: memref<128x128xf32, #tpu.memory_space<vmem>>, %arg4: memref<1x128xf32, #tpu.memory_space<vmem>>, %arg5: memref<8x128xf32, #tpu.memory_space<vmem>>) attributes {dimension_semantics = [#tpu.dimension_semantics<parallel>, #tpu.dimension_semantics<parallel>], iteration_bounds = array<i64: 1, 1>, scalar_prefetch = 0 : i64, scratch_operands = 0 : i64, tpu.core_type = #tpu.core_type<tc>, window_params = [{transform_indices = @transform_0, window_bounds = array<i64: 8, 128>}, {transform_indices = @transform_1, window_bounds = array<i64: 128, 128>}, {transform_indices = @transform_2, window_bounds = array<i64: 1, 128>}, {transform_indices = @transform_3, window_bounds = array<i64: 8, 128>}]} {
    %c0 = arith.constant 0 : index
    %c0_0 = arith.constant 0 : index
    %0 = vector.load %arg2[%c0, %c0_0] : memref<8x128xf32, #tpu.memory_space<vmem>>, vector<8x128xf32>
    %c0_1 = arith.constant 0 : index
    %c0_2 = arith.constant 0 : index
    %1 = vector.load %arg3[%c0_1, %c0_2] : memref<128x128xf32, #tpu.memory_space<vmem>>, vector<128x128xf32>
    %cst = arith.constant dense<0.000000e+00> : vector<8x128xf32>
    %2 = tpu.matmul %0, %1, %cst {dimension_numbers = #tpu.dot_dimension_numbers<[1], [0], [0], [1], [0, 0, 1, 1], [], []>} : vector<8x128xf32>, vector<128x128xf32>, vector<8x128xf32> -> vector<8x128xf32>
    %c0_3 = arith.constant 0 : index
    %c0_4 = arith.constant 0 : index
    %3 = vector.load %arg4[%c0_3, %c0_4] : memref<1x128xf32, #tpu.memory_space<vmem>>, vector<1x128xf32>
    %4 = vector.broadcast %3 : vector<1x128xf32> to vector<8x128xf32>
    %5 = arith.addf %2, %4 : vector<8x128xf32>
    %c0_5 = arith.constant 0 : index
    %c0_6 = arith.constant 0 : index
    %6 = vector.load %arg5[%c0_5, %c0_6] : memref<8x128xf32, #tpu.memory_space<vmem>>, vector<8x128xf32>
    tpu.vector_store %arg5[%c0_5, %c0_6], %5 {strides = array<i32>} : memref<8x128xf32, #tpu.memory_space<vmem>>, vector<8x128xf32>,
    return
  }
  func.func @transform_0(%arg0: i32, %arg1: i32) -> (i32, i32) {
    %c0_i32 = arith.constant 0 : i32
    %c0_i32_0 = arith.constant 0 : i32
    return %arg0, %c0_i32 : i32, i32
  }
  func.func @transform_1(%arg0: i32, %arg1: i32) -> (i32, i32) {
    %c0_i32 = arith.constant 0 : i32
    %c0_i32_0 = arith.constant 0 : i32
    return %c0_i32, %arg1 : i32, i32
  }
  func.func @transform_2(%arg0: i32, %arg1: i32) -> (i32, i32) {
    %c0_i32 = arith.constant 0 : i32
    %c0_i32_0 = arith.constant 0 : i32
    return %c0_i32, %arg1 : i32, i32
  }
  func.func @transform_3(%arg0: i32, %arg1: i32) -> (i32, i32) {
    %c0_i32 = arith.constant 0 : i32
    return %arg0, %arg1 : i32, i32
  }
}

</mosaic_0001>

<bundles_post_ra>
// kernel: tpu_custom_call.1
= control target key start
LH: loop header
LB: loop body
LE: loop exit
PB: predicated region body
PF: predicated region fallthrough
CT: control target
= control target key end

     0   :  { %8 = vsyncpa [#allocation3], 0  ;;  %s226_s0 = inlined_call_operand.hbm [shape: f32[8,128], index: 0, kind: input, shape index: {}]   ;;  %s227_s1 = inlined_call_operand.hbm [shape: f32[128,128], index: 1, kind: input, shape index: {}]   ;;  %s228_s2 = inlined_call_operand.vmem [shape: f32[1,128], index: 2, kind: input, shape index: {}]   ;;  %s229_s3 = inlined_call_operand.hbm [shape: f32[8,128], index: 3, kind: output, shape index: {}]  }
   0x1   :  { %9 = vsyncpa [#allocation6], 0 }
   0x2   :  { %10 = vsyncpa [#allocation4], 0  ;;  %s16_s14 = sshll.u32 %s226_s0, 4  ;;  %s189_s15 = smov [#allocation2]   ;;  %s17_s14 = int_to_ptr.hbm [resolvable:$true] %s16_s14 }
   0x3   :  { %s18_s16 = sshll.u32 %s189_s15, 4  ;;  %s26_s19 = sshll.u32 %s227_s1, 4  ;;  %s19_s16 = int_to_ptr.vmem [resolvable:$true] %s18_s16  ;;  %s27_s19 = int_to_ptr.hbm [resolvable:$true] %s26_s19 }
   0x4   :  { %21 = dma.hbm_to_vmem [thread:$0]  %s17_s14, 128, %s19_s16, [#allocation3]  }
   0x5   :  { %s190_s20 = smov [#allocation5]   ;;  %s191_s22 = smov 128  }
   0x6   :  { %s28_s21 = sshll.u32 %s190_s20, 4  ;;  %s192_s23 = smov 8   ;;  %s29_s21 = int_to_ptr.vmem [resolvable:$true] %s28_s21 }
   0x7   :  { %34 = dma.hbm_to_vmem [thread:$0]  %s27_s19, 2048, %s29_s21, [#allocation6], %s191_s22, %s191_s22, %s192_s23  }
   0x8   :  { %183 = dma.done.wait [#allocation3], 128  }
   0x9   :  { %184 = vsyncadd [#allocation3], 4294967168 }
   0xa   :  { %185 = dma.done.wait [#allocation6], 2048  }
   0xb   :  { %186 = vsyncadd [#allocation6], 4294965248  ;;  %v61_v0 = vld [vmem:[#allocation5 + $0x78] sm:$0xff]  ;;  %v60_v1 = vld [vmem:[#allocation5 + $0x70] sm:$0xff]  ;;  %s193_s24 = smov [#allocation7]   ;;  %s94_s28 = sshll.u32 %s229_s3, 4  ;;  %s95_s28 = int_to_ptr.hbm [resolvable:$true] %s94_s28 }
   0xc   :  { %66 = vmatpush.msra.mxu0 %v61_v0  ;;  %v59_v2 = vld [vmem:[#allocation5 + $0x68] sm:$0xff]  ;;  %v58_v3 = vld [vmem:[#allocation5 + $0x60] sm:$0xff]  ;;  %v57_v4 = vld [vmem:[#allocation5 + $0x58] sm:$0xff]  ;;  %s92_s25 = sshll.u32 %s193_s24, 4  ;;  %s93_s25 = int_to_ptr.vmem [resolvable:$true] %s92_s25 }
   0xd   :  { %v56_v5 = vld [vmem:[#allocation5 + $0x50] sm:$0xff]  ;;  %v55_v6 = vld [vmem:[#allocation5 + $0x48] sm:$0xff]  ;;  %v54_v7 = vld [vmem:[#allocation5 + $0x40] sm:$0xff] }
   0xe   :  { %67 = vmatpush.msra.mxu0 %v60_v1  ;;  %v53_v8 = vld [vmem:[#allocation5 + $0x38] sm:$0xff]  ;;  %v52_v9 = vld [vmem:[#allocation5 + $0x30] sm:$0xff]  ;;  %v51_v10 = vld [vmem:[#allocation5 + $0x28] sm:$0xff] }
   0xf   :  { %v50_v11 = vld [vmem:[#allocation5 + $0x20] sm:$0xff]  ;;  %v49_v12 = vld [vmem:[#allocation5 + $0x18] sm:$0xff]  ;;  %v48_v13 = vld [vmem:[#allocation5 + $0x10] sm:$0xff] }
  0x10   :  { %68 = vmatpush.msra.mxu0 %v59_v2  ;;  %v47_v14 = vld [vmem:[#allocation5 + $0x8] sm:$0xff]  ;;  %v46_v15 = vld [vmem:[#allocation5] sm:$0xff]  ;;  %v45_v16 = vld [vmem:[#allocation2] sm:$0xff] }
  0x11   :  { %v110_v17 = vld [vmem:[%s228_s2] ss:$0 sm:$0xff] }
  0x12   :  { %69 = vmatpush.msra.mxu0 %v58_v3 }
  0x14   :  { %70 = vmatpush.msra.mxu0 %v57_v4 }
  0x16   :  { %71 = vmatpush.msra.mxu0 %v56_v5 }
  0x18   :  { %72 = vmatpush.msra.mxu0 %v55_v6 }
  0x1a   :  { %73 = vmatpush.msra.mxu0 %v54_v7 }
  0x1c   :  { %74 = vmatpush.msra.mxu0 %v53_v8 }
  0x1e   :  { %75 = vmatpush.msra.mxu0 %v52_v9 }
  0x20   :  { %76 = vmatpush.msra.mxu0 %v51_v10 }
  0x22   :  { %77 = vmatpush.msra.mxu0 %v50_v11 }
  0x24   :  { %78 = vmatpush.msra.mxu0 %v49_v12 }
  0x26   :  { %79 = vmatpush.msra.mxu0 %v48_v13 }
  0x28   :  { %80 = vmatpush.msra.mxu0 %v47_v14 }
  0x2a   :  { %81 = vmatpush.msra.mxu0 %v46_v15 }
  0x2b   :  { %82 = vmatmul.f32.vlgmr.msra.gmra.mxu0 %v45_v16 }
  0xa8   :  { %v83_v18 = vpop.f32.mrf.mxu0 }
  0xa9   :  { %v84_v19 = vadd.f32 %v110_v17, %v83_v18 }
  0xab   :  { %86 = vst [vmem:[#allocation7] sm:$0xff] %v84_v19 }
  0xac   :  { %97 = dma.vmem_to_hbm [thread:$0]  %s93_s25, 128, %s95_s28, [#allocation4]  }
  0xad   :  { %187 = dma.done.wait [#allocation4], 128  }
  0xae   :  { %188 = vsyncadd [#allocation4], 4294967168 }
  0xaf   :  { %102 = vsyncpa [#allocation3], 1 }
  0xb0   :  { %103 = vsyncpa [#allocation6], 1 }
  0xb1   :  { %104 = vsyncpa [#allocation4], 1 }

</bundles_post_ra>
